<compile_context>
chip_gen: v7x
topology: tpu7x:2x2x1
jax: 0.10.0
libtpu: 0.0.40
codegen_flags: <defaults>
</compile_context>

<pallas_src>
import jax
import jax.numpy as jnp
from jax.experimental import pallas as pl
from jax.experimental.pallas import tpu as pltpu


# ----------------------------------------------------------------------------
# VMEM budgeting helpers
# ----------------------------------------------------------------------------
def _vmem_limit_bytes():
    """Scoped-VMEM limit to request: ~75% of physical, capped at 100 MiB."""
    try:
        cap = int(pltpu.get_tpu_info().vmem_capacity_bytes)
    except Exception:
        cap = 64 << 20          # conservative: v7x per-TensorCore VMEM
    return min((cap * 3) // 4, 100 << 20)


def _pick_spatial_tile(hw_pad, c, vmem_limit_bytes, min_steps=1):
    """Largest multiple-of-128 divisor of hw_pad fitting the VMEM budget.

    Per grid step the split kernel needs roughly 25*C*T bytes
    (double-buffered f32 in/out blocks + f32/bf16 temporaries).
    """
    t_cap = (int(0.8 * vmem_limit_bytes) // (25 * c)) // 128 * 128
    t_cap = max(128, t_cap)
    t_cap = min(t_cap, hw_pad)
    if min_steps > 1:
        t_cap = min(t_cap, max(128, (hw_pad // min_steps) // 128 * 128))
    best = 128
    t = 128
    while t <= t_cap:
        if hw_pad % t == 0:
            best = t
        t += 128
    return best


# ----------------------------------------------------------------------------
# Kernels
# ----------------------------------------------------------------------------
def _make_resident_kernel(hw_actual, matmul_dtype):
    """One grid step = one full (C, HW_pad) slab of one batch element."""
    inv_hw = 1.0 / float(hw_actual)

    def kernel(x_ref, lw1_ref, lb1_ref, lw2_ref,
               gw1_ref, gb1_ref, gw2_ref, bc_ref, o_ref):
        x = x_ref[0].astype(jnp.float32)                          # (C, HWp)

        # Global branch: GAP -> 1x1 conv -> ReLU -> 1x1 conv (tiny, f32).
        # Padding lanes are zero, so sum/HW_actual is the true mean.
        xm = jnp.sum(x, axis=1, keepdims=True) * inv_hw           # (C, 1)
        g1 = jnp.dot(gw1_ref[...], xm, preferred_element_type=jnp.float32)
        g1 = jnp.maximum(g1 + gb1_ref[...], 0.0)                  # (Cr, 1)
        xg = jnp.dot(gw2_ref[...], g1, preferred_element_type=jnp.float32)

        # Local branch: per-pixel channel MLP (bf16 operands, f32 accumulate).
        xmm = x.astype(matmul_dtype)
        l1 = jnp.dot(lw1_ref[...], xmm, preferred_element_type=jnp.float32)
        l1 = jnp.maximum(l1 + lb1_ref[...], 0.0).astype(matmul_dtype)
        xl = jnp.dot(lw2_ref[...], l1, preferred_element_type=jnp.float32)

        # bc = lb2 + gb2 folded into one broadcast add.
        wei = jax.nn.sigmoid(xl + xg + bc_ref[...])               # (C, HWp)
        o_ref[0] = (x * wei).astype(o_ref.dtype)

    return kernel


def _make_split_kernel(matmul_dtype):
    """One grid step = one (C, T) spatial tile; global vector precomputed."""

    def kernel(x_ref, xg_ref, lw1_ref, lb1_ref, lw2_ref, o_ref):
        x = x_ref[0].astype(jnp.float32)                          # (C, T)
        xmm = x.astype(matmul_dtype)
        l1 = jnp.dot(lw1_ref[...], xmm, preferred_element_type=jnp.float32)
        l1 = jnp.maximum(l1 + lb1_ref[...], 0.0).astype(matmul_dtype)
        xl = jnp.dot(lw2_ref[...], l1, preferred_element_type=jnp.float32)
        # xg already contains the full global-branch output plus lb2.
        wei = jax.nn.sigmoid(xl + xg_ref[0])                      # (C, T)
        o_ref[0] = (x * wei).astype(o_ref.dtype)

    return kernel


# ----------------------------------------------------------------------------
# Wrapper
# ----------------------------------------------------------------------------
def ms_cam_pallas(x_nchw, params, *, matmul_dtype=jnp.bfloat16,
                  force_variant=None, donate_x=False):
    """MS_CAM forward. x_nchw: (B, C, H, W). params: BN-folded weights."""
    B, C, H, W = x_nchw.shape
    HW = H * W
    HW_pad = ((HW + 127) // 128) * 128
    out_dtype = x_nchw.dtype

    x = x_nchw.reshape(B, C, HW)
    x_pad = jnp.pad(x, ((0, 0), (0, 0), (0, HW_pad - HW))) if HW_pad != HW else x

    vmem_limit = _vmem_limit_bytes()

    # Local-branch weights pre-cast once (resident in VMEM across grid steps).
    lw1 = params["lw1"].astype(matmul_dtype)                      # (Cr, C)
    lw2 = params["lw2"].astype(matmul_dtype)                      # (C, Cr)
    lb1 = params["lb1"][:, None].astype(jnp.float32)              # (Cr, 1)

    # Resident variant needs ~8x the slab in VMEM (dbl-buffered in/out + temps).
    slab_bytes = C * HW_pad * 4
    use_resident = (8 * slab_bytes <= int(0.8 * vmem_limit)) and (B >= 2)
    if force_variant == "resident":
        use_resident = True
    elif force_variant == "split":
        use_resident = False

    io_alias = {0: 0} if donate_x else {}

    if use_resident:
        gw1 = params["gw1"].astype(jnp.float32)                   # (Cr, C)
        gb1 = params["gb1"][:, None].astype(jnp.float32)          # (Cr, 1)
        gw2 = params["gw2"].astype(jnp.float32)                   # (C, Cr)
        b_comb = (params["gb2"] + params["lb2"])[:, None].astype(jnp.float32)

        def resident(arr):  # constant block index -> stays in VMEM
            return pl.BlockSpec(arr.shape, lambda b: (0, 0))

        out = pl.pallas_call(
            _make_resident_kernel(HW, matmul_dtype),
            out_shape=jax.ShapeDtypeStruct((B, C, HW_pad), out_dtype),
            grid_spec=pltpu.PrefetchScalarGridSpec(
                num_scalar_prefetch=0,
                grid=(B,),
                in_specs=[
                    pl.BlockSpec((1, C, HW_pad), lambda b: (b, 0, 0)),  # x slab
                    resident(lw1), resident(lb1), resident(lw2),
                    resident(gw1), resident(gb1), resident(gw2),
                    resident(b_comb),
                ],
                out_specs=pl.BlockSpec((1, C, HW_pad), lambda b: (b, 0, 0)),
            ),
            compiler_params=pltpu.CompilerParams(
                dimension_semantics=("parallel",),
                vmem_limit_bytes=vmem_limit),
            input_output_aliases=io_alias,
        )(x_pad, lw1, lb1, lw2, gw1, gb1, gw2, b_comb)
    else:
        # Fallback: hoist global branch (mean over unpadded x + tiny MLP),
        # fold lb2 into it, and stream spatial tiles.
        xm = jnp.mean(x.astype(jnp.float32), axis=2)                       # (B, C)
        g1 = jnp.maximum(xm @ params["gw1"].T + params["gb1"], 0.0)        # (B, Cr)
        xg = g1 @ params["gw2"].T + params["gb2"] + params["lb2"]          # (B, C)
        xg = xg[:, :, None].astype(jnp.float32)                            # (B, C, 1)

        T = _pick_spatial_tile(HW_pad, C, vmem_limit,
                               min_steps=2 if B == 1 else 1)
        n_t = HW_pad // T

        def resident2(arr):
            return pl.BlockSpec(arr.shape, lambda b, t: (0, 0))

        out = pl.pallas_call(
            _make_split_kernel(matmul_dtype),
            out_shape=jax.ShapeDtypeStruct((B, C, HW_pad), out_dtype),
            grid_spec=pltpu.PrefetchScalarGridSpec(
                num_scalar_prefetch=0,
                grid=(B, n_t),
                in_specs=[
                    pl.BlockSpec((1, C, T), lambda b, t: (b, 0, t)),   # x tile
                    pl.BlockSpec((1, C, 1), lambda b, t: (b, 0, 0)),   # xg
                    resident2(lw1), resident2(lb1), resident2(lw2),
                ],
                out_specs=pl.BlockSpec((1, C, T), lambda b, t: (b, 0, t)),
            ),
            compiler_params=pltpu.CompilerParams(
                dimension_semantics=("parallel", "parallel"),
                vmem_limit_bytes=vmem_limit),
            input_output_aliases=io_alias,
        )(x_pad, xg, lw1, lb1, lw2)

    if HW_pad != HW:
        out = out[:, :, :HW]
    return out.reshape(B, C, H, W)


# ----------------------------------------------------------------------------
# Parameter construction: deterministic init + fold eval-mode BatchNorm into
# the preceding 1x1 conv:  BN(Wx + b) = (s*W)x + (s*b + t),
#   s = gamma / sqrt(var + eps), t = beta - mean * s.
# All weights stored output-major (Cout, Cin); biases 1-D (Cout,).
# ----------------------------------------------------------------------------
def make_params(key, channels, r):
    inter = max(1, channels // r)
    eps = 1e-5

    def conv_bn(k, cin, cout):
        kw, kb, kg, kbeta, km, kv = jax.random.split(k, 6)
        w = jax.random.normal(kw, (cout, cin), jnp.float32) * 0.1
        b = jax.random.normal(kb, (cout,), jnp.float32) * 0.1
        gamma = 1.0 + 0.1 * jax.random.normal(kg, (cout,), jnp.float32)
        beta = 0.1 * jax.random.normal(kbeta, (cout,), jnp.float32)
        mean = 0.1 * jax.random.normal(km, (cout,), jnp.float32)
        var = jnp.abs(jax.random.normal(kv, (cout,), jnp.float32)) * 0.1 + 1.0
        s = gamma / jnp.sqrt(var + eps)
        t = beta - mean * s
        return w * s[:, None], b * s + t

    k1, k2, k3, k4 = jax.random.split(key, 4)
    lw1, lb1 = conv_bn(k1, channels, inter)
    lw2, lb2 = conv_bn(k2, inter, channels)
    gw1, gb1 = conv_bn(k3, channels, inter)
    gw2, gb2 = conv_bn(k4, inter, channels)
    return dict(lw1=lw1, lb1=lb1, lw2=lw2, lb2=lb2,
                gw1=gw1, gb1=gb1, gw2=gw2, gb2=gb2)


def ms_cam_reference(x_nchw, p):
    """Pure-JAX reference with identical (BN-folded) math, for validation."""
    B, C, H, W = x_nchw.shape
    x = x_nchw.reshape(B, C, H * W).astype(jnp.float32)
    l1 = jnp.maximum(jnp.einsum("rc,bcs->brs", p["lw1"], x)
                     + p["lb1"][None, :, None], 0.0)
    xl = jnp.einsum("cr,brs->bcs", p["lw2"], l1) + p["lb2"][None, :, None]
    xm = jnp.mean(x, axis=2)
    g1 = jnp.maximum(jnp.einsum("rc,bc->br", p["gw1"], xm) + p["gb1"][None], 0.0)
    xg = jnp.einsum("cr,br->bc", p["gw2"], g1) + p["gb2"][None]
    wei = jax.nn.sigmoid(xl + xg[:, :, None])
    return (x * wei).reshape(B, C, H, W).astype(x_nchw.dtype)


if __name__ == "__main__":
    key = jax.random.PRNGKey(0)
    kx, kp, kx2, kp2 = jax.random.split(key, 4)

    # Case 1: module defaults (channels=64, r=4); HW already a multiple of 128.
    B, C, H, W, r = 2, 64, 16, 16, 4
    x = jax.random.normal(kx, (B, C, H, W), jnp.float32)
    params = make_params(kp, C, r)
    ref = ms_cam_reference(x, params)

    # Resident (single-pass) variant, f32 matmuls -> bit-tight check.
    out_res = jax.block_until_ready(
        ms_cam_pallas(x, params, matmul_dtype=jnp.float32,
                      force_variant="resident"))
    assert out_res.shape == x.shape
    assert jnp.max(jnp.abs(out_res - ref)) < 1e-4

    # Split (streaming) fallback variant, f32 matmuls.
    out_split = jax.block_until_ready(
        ms_cam_pallas(x, params, matmul_dtype=jnp.float32,
                      force_variant="split"))
    assert jnp.max(jnp.abs(out_split - ref)) < 1e-4

    # Default fast path: bf16 MXU operands (gate math stays f32).
    out_bf16 = jax.block_until_ready(ms_cam_pallas(x, params))
    assert jnp.max(jnp.abs(out_bf16 - ref)) < 3e-2

    # Case 2: non-multiple-of-128 spatial extent (14x14) -> padded lane dim.
    B2, C2, H2, W2 = 2, 32, 14, 14
    x2 = jax.random.normal(kx2, (B2, C2, H2, W2), jnp.float32)
    params2 = make_params(kp2, C2, 4)
    ref2 = ms_cam_reference(x2, params2)
    out2 = jax.block_until_ready(
        ms_cam_pallas(x2, params2, matmul_dtype=jnp.float32))
    assert jnp.max(jnp.abs(out2 - ref2)) < 1e-4

    print("KERNEL_OK")
</pallas_src>

<mosaic_0001>
module attributes {stable_mosaic.version = 11 : i64} {
  func.func @kernel(%arg0: i32, %arg1: memref<1x64x256xf32, #tpu.memory_space<vmem>>, %arg2: memref<16x64xf32, #tpu.memory_space<vmem>>, %arg3: memref<16x1xf32, #tpu.memory_space<vmem>>, %arg4: memref<64x16xf32, #tpu.memory_space<vmem>>, %arg5: memref<16x64xf32, #tpu.memory_space<vmem>>, %arg6: memref<16x1xf32, #tpu.memory_space<vmem>>, %arg7: memref<64x16xf32, #tpu.memory_space<vmem>>, %arg8: memref<64x1xf32, #tpu.memory_space<vmem>>, %arg9: memref<1x64x256xf32, #tpu.memory_space<vmem>>) attributes {dimension_semantics = [#tpu.dimension_semantics<parallel>], iteration_bounds = array<i64: 2>, scalar_prefetch = 0 : i64, scratch_operands = 0 : i64, tpu.core_type = #tpu.core_type<tc>, window_params = [{transform_indices = @transform_0, window_bounds = array<i64: 1, 64, 256>}, {pipeline_mode = #tpu.pipeline_mode<synchronous>, transform_indices = @transform_1, window_bounds = array<i64: 16, 64>}, {pipeline_mode = #tpu.pipeline_mode<synchronous>, transform_indices = @transform_2, window_bounds = array<i64: 16, 1>}, {pipeline_mode = #tpu.pipeline_mode<synchronous>, transform_indices = @transform_3, window_bounds = array<i64: 64, 16>}, {pipeline_mode = #tpu.pipeline_mode<synchronous>, transform_indices = @transform_4, window_bounds = array<i64: 16, 64>}, {pipeline_mode = #tpu.pipeline_mode<synchronous>, transform_indices = @transform_5, window_bounds = array<i64: 16, 1>}, {pipeline_mode = #tpu.pipeline_mode<synchronous>, transform_indices = @transform_6, window_bounds = array<i64: 64, 16>}, {pipeline_mode = #tpu.pipeline_mode<synchronous>, transform_indices = @transform_7, window_bounds = array<i64: 64, 1>}, {transform_indices = @transform_8, window_bounds = array<i64: 1, 64, 256>}]} {
    %c0 = arith.constant 0 : index
    %c0_0 = arith.constant 0 : index
    %c0_1 = arith.constant 0 : index
    %0 = vector.load %arg1[%c0, %c0_0, %c0_1] : memref<1x64x256xf32, #tpu.memory_space<vmem>>, vector<1x64x256xf32>
    %1 = vector.shape_cast %0 : vector<1x64x256xf32> to vector<64x256xf32>
    %cst = arith.constant dense<0.000000e+00> : vector<64xf32>
    %2 = vector.multi_reduction <add>, %1, %cst [1] : vector<64x256xf32> to vector<64xf32>
    %3 = vector.shape_cast %2 : vector<64xf32> to vector<64x1xf32>
    %cst_2 = arith.constant 3.906250e-03 : f32
    %4 = vector.broadcast %cst_2 : f32 to vector<64x1xf32>
    %5 = arith.mulf %3, %4 : vector<64x1xf32>
    %c0_3 = arith.constant 0 : index
    %c0_4 = arith.constant 0 : index
    %6 = vector.load %arg5[%c0_3, %c0_4] : memref<16x64xf32, #tpu.memory_space<vmem>>, vector<16x64xf32>
    %cst_5 = arith.constant dense<0.000000e+00> : vector<16x1xf32>
    %7 = tpu.matmul %6, %5, %cst_5 {dimension_numbers = #tpu.dot_dimension_numbers<[1], [0], [0], [1], [0, 0, 1, 1], [], []>} : vector<16x64xf32>, vector<64x1xf32>, vector<16x1xf32> -> vector<16x1xf32>
    %c0_6 = arith.constant 0 : index
    %c0_7 = arith.constant 0 : index
    %8 = vector.load %arg6[%c0_6, %c0_7] : memref<16x1xf32, #tpu.memory_space<vmem>>, vector<16x1xf32>
    %9 = arith.addf %7, %8 : vector<16x1xf32>
    %cst_8 = arith.constant 0.000000e+00 : f32
    %10 = vector.broadcast %cst_8 : f32 to vector<16x1xf32>
    %11 = arith.maximumf %9, %10 : vector<16x1xf32>
    %c0_9 = arith.constant 0 : index
    %c0_10 = arith.constant 0 : index
    %12 = vector.load %arg7[%c0_9, %c0_10] : memref<64x16xf32, #tpu.memory_space<vmem>>, vector<64x16xf32>
    %cst_11 = arith.constant dense<0.000000e+00> : vector<64x1xf32>
    %13 = tpu.matmul %12, %11, %cst_11 {dimension_numbers = #tpu.dot_dimension_numbers<[1], [0], [0], [1], [0, 0, 1, 1], [], []>} : vector<64x16xf32>, vector<16x1xf32>, vector<64x1xf32> -> vector<64x1xf32>
    %c0_12 = arith.constant 0 : index
    %c0_13 = arith.constant 0 : index
    %14 = vector.load %arg2[%c0_12, %c0_13] : memref<16x64xf32, #tpu.memory_space<vmem>>, vector<16x64xf32>
    %cst_14 = arith.constant dense<0.000000e+00> : vector<16x256xf32>
    %15 = tpu.matmul %14, %1, %cst_14 {dimension_numbers = #tpu.dot_dimension_numbers<[1], [0], [0], [1], [0, 0, 1, 1], [], []>} : vector<16x64xf32>, vector<64x256xf32>, vector<16x256xf32> -> vector<16x256xf32>
    %c0_15 = arith.constant 0 : index
    %c0_16 = arith.constant 0 : index
    %16 = vector.load %arg3[%c0_15, %c0_16] : memref<16x1xf32, #tpu.memory_space<vmem>>, vector<16x1xf32>
    %17 = vector.broadcast %16 : vector<16x1xf32> to vector<16x256xf32>
    %18 = arith.addf %15, %17 : vector<16x256xf32>
    %cst_17 = arith.constant 0.000000e+00 : f32
    %19 = vector.broadcast %cst_17 : f32 to vector<16x256xf32>
    %20 = arith.maximumf %18, %19 : vector<16x256xf32>
    %c0_18 = arith.constant 0 : index
    %c0_19 = arith.constant 0 : index
    %21 = vector.load %arg4[%c0_18, %c0_19] : memref<64x16xf32, #tpu.memory_space<vmem>>, vector<64x16xf32>
    %cst_20 = arith.constant dense<0.000000e+00> : vector<64x256xf32>
    %22 = tpu.matmul %21, %20, %cst_20 {dimension_numbers = #tpu.dot_dimension_numbers<[1], [0], [0], [1], [0, 0, 1, 1], [], []>} : vector<64x16xf32>, vector<16x256xf32>, vector<64x256xf32> -> vector<64x256xf32>
    %23 = vector.broadcast %13 : vector<64x1xf32> to vector<64x256xf32>
    %24 = arith.addf %22, %23 : vector<64x256xf32>
    %c0_21 = arith.constant 0 : index
    %c0_22 = arith.constant 0 : index
    %25 = vector.load %arg8[%c0_21, %c0_22] : memref<64x1xf32, #tpu.memory_space<vmem>>, vector<64x1xf32>
    %26 = vector.broadcast %25 : vector<64x1xf32> to vector<64x256xf32>
    %27 = arith.addf %24, %26 : vector<64x256xf32>
    %28 = arith.negf %27 : vector<64x256xf32>
    %29 = math.exp %28 : vector<64x256xf32>
    %cst_23 = arith.constant 1.000000e+00 : f32
    %30 = vector.broadcast %cst_23 : f32 to vector<64x256xf32>
    %31 = arith.addf %30, %29 : vector<64x256xf32>
    %32 = arith.divf %30, %31 : vector<64x256xf32>
    %33 = arith.mulf %1, %32 : vector<64x256xf32>
    %c0_24 = arith.constant 0 : index
    %c0_25 = arith.constant 0 : index
    %c0_26 = arith.constant 0 : index
    %34 = vector.load %arg9[%c0_24, %c0_25, %c0_26] : memref<1x64x256xf32, #tpu.memory_space<vmem>>, vector<1x64x256xf32>
    %35 = vector.shape_cast %34 : vector<1x64x256xf32> to vector<64x256xf32>
    %36 = vector.shape_cast %33 : vector<64x256xf32> to vector<1x64x256xf32>
    tpu.vector_store %arg9[%c0_24, %c0_25, %c0_26], %36 {strides = array<i32>} : memref<1x64x256xf32, #tpu.memory_space<vmem>>, vector<1x64x256xf32>,
    return
  }
  func.func @transform_0(%arg0: i32) -> (i32, i32, i32) {
    %c0_i32 = arith.constant 0 : i32
    %c0_i32_0 = arith.constant 0 : i32
    %c0_i32_1 = arith.constant 0 : i32
    return %arg0, %c0_i32, %c0_i32_0 : i32, i32, i32
  }
  func.func @transform_1(%arg0: i32) -> (i32, i32) {
    %c0_i32 = arith.constant 0 : i32
    %c0_i32_0 = arith.constant 0 : i32
    %c0_i32_1 = arith.constant 0 : i32
    return %c0_i32, %c0_i32_0 : i32, i32
  }
  func.func @transform_2(%arg0: i32) -> (i32, i32) {
    %c0_i32 = arith.constant 0 : i32
    %c0_i32_0 = arith.constant 0 : i32
    %c0_i32_1 = arith.constant 0 : i32
    return %c0_i32, %c0_i32_0 : i32, i32
  }
  func.func @transform_3(%arg0: i32) -> (i32, i32) {
    %c0_i32 = arith.constant 0 : i32
    %c0_i32_0 = arith.constant 0 : i32
    %c0_i32_1 = arith.constant 0 : i32
    return %c0_i32, %c0_i32_0 : i32, i32
  }
  func.func @transform_4(%arg0: i32) -> (i32, i32) {
    %c0_i32 = arith.constant 0 : i32
    %c0_i32_0 = arith.constant 0 : i32
    %c0_i32_1 = arith.constant 0 : i32
    return %c0_i32, %c0_i32_0 : i32, i32
  }
  func.func @transform_5(%arg0: i32) -> (i32, i32) {
    %c0_i32 = arith.constant 0 : i32
    %c0_i32_0 = arith.constant 0 : i32
    %c0_i32_1 = arith.constant 0 : i32
    return %c0_i32, %c0_i32_0 : i32, i32
  }
  func.func @transform_6(%arg0: i32) -> (i32, i32) {
    %c0_i32 = arith.constant 0 : i32
    %c0_i32_0 = arith.constant 0 : i32
    %c0_i32_1 = arith.constant 0 : i32
    return %c0_i32, %c0_i32_0 : i32, i32
  }
  func.func @transform_7(%arg0: i32) -> (i32, i32) {
    %c0_i32 = arith.constant 0 : i32
    %c0_i32_0 = arith.constant 0 : i32
    %c0_i32_1 = arith.constant 0 : i32
    return %c0_i32, %c0_i32_0 : i32, i32
  }
  func.func @transform_8(%arg0: i32) -> (i32, i32, i32) {
    %c0_i32 = arith.constant 0 : i32
    %c0_i32_0 = arith.constant 0 : i32
    %c0_i32_1 = arith.constant 0 : i32
    return %arg0, %c0_i32, %c0_i32_0 : i32, i32, i32
  }
}

</mosaic_0001>

<bundles_post_ra>
// kernel: tpu_custom_call.1
= control target key start
LH: loop header
LB: loop body
LE: loop exit
PB: predicated region body
PF: predicated region fallthrough
CT: control target
= control target key end

     0   :  { %13 = vsyncpa [#allocation3], 0  ;;  %s2061_s0 = inlined_call_operand.vmem [shape: f32[2,64,256], index: 0, kind: input, shape index: {}]   ;;  %s2062_s1 = inlined_call_operand.hbm [shape: f32[16,64], index: 1, kind: input, shape index: {}]   ;;  %s2063_s2 = inlined_call_operand.vmem [shape: f32[16,1], index: 2, kind: input, shape index: {}]   ;;  %s2064_s3 = inlined_call_operand.vmem [shape: f32[64,16], index: 3, kind: input, shape index: {}]   ;;  %s2065_s4 = inlined_call_operand.hbm [shape: f32[16,64], index: 4, kind: input, shape index: {}]   ;;  %s2066_s5 = inlined_call_operand.vmem [shape: f32[16,1], index: 5, kind: input, shape index: {}]   ;;  %s2067_s6 = inlined_call_operand.vmem [shape: f32[64,16], index: 6, kind: input, shape index: {}]   ;;  %s2068_s7 = inlined_call_operand.vmem [shape: f32[64,1], index: 7, kind: input, shape index: {}]   ;;  %s2069_s8 = inlined_call_operand.hbm [shape: f32[2,64,256], index: 8, kind: output, shape index: {}]  }
   0x1   :  { %14 = vsyncpa [#allocation6], 0 }
   0x2   :  { %15 = vsyncpa [#allocation4], 0 }
   0x3   :  { %17 = vsyncpa [#allocation4 + $0x1], 0  ;;  %s1649_s27 = smov 0   ;;  %s1651_s28 = smov 0  }
   0x4   :  { %s1653_s29 = smov 0   ;;  %s1655_s30 = smov 0  }
   0x5 LB: > { %2074 = sst [smem:[#allocation11_spill]] %s1589_s29  ;;  %s1670_s9 = sadd.s32 4294967295, %s1593_s30   ;;  %s1593_s30 = sphi %s1655_s30, %s2091_s30   ;;  %s1589_s29 = sphi %s1653_s29, %s2088_s29   ;;  %s1585_s28 = sphi %s1651_s28, %s2090_s28   ;;  %s1581_s27 = sphi %s1649_s27, %s2089_s27  }
   0x6   : > { %s1184_s10 = sadd.s32 4294967294, %s1593_s30   ;;  %s1674_s11 = sadd.s32 1, %s1593_s30  }
   0x7   : > { %s203_s12 = sadd.s32 1, %s1589_s29  ;;  %s200_s13 = ssub.s32 %s1593_s30, %s1674_s11 }
   0x8   : > { %p213_p0 = scmp.ne.s32.totalorder %s1589_s29, %s1585_s28  ;;  %p201_p1 = scmp.eq.s32.totalorder %s200_s13, 0 }
   0x9   : > { %p214_p2 = scmp.eq.s32.totalorder %s1670_s9, 1  ;;  %p219_p3 = scmp.ne.s32.totalorder %s1585_s28, %s1581_s27 }
   0xa   : > { %p220_p4 = scmp.eq.s32.totalorder %s1184_s10, 1  ;;  %p1185_p7 = scmp.ge.s32.totalorder %s1593_s30, 1 }
   0xb   : > { %s1685_s14 = scalar_select %p201_p1, %s1589_s29, %s203_s12  }
   0xc   : > { %p1687_p5 = por %p214_p2, %p213_p0  ;;  %p1691_p6 = por %p220_p4, %p219_p3 }
   0xd   : > { %2075 = sst [smem:[#allocation12_spill]] %s1685_s14  ;;  %p227_p8 = scmp.lt.s32.totalorder %s1593_s30, 3 }
   0xe   : > { %s2076_s15 = scalar_select %p1687_p5, 1, 0 }
   0xf   : > { %s2077_s16 = scalar_select %p1691_p6, 1, 0 }
  0x10   : > { %p2070_p9 = scmp.eq.s32.totalorder %s1670_s9, 0  ;;  %p1698_p10 = pnand %p1185_p7, %p227_p8 }
  0x11   : > { %s1595_s18 = smov [#allocation2]   ;;  %s1596_s21 = smov [#allocation5]  }
  0x12   : > { %s2078_s17 = scalar_select %p1698_p10, 1, 0 }
  0x13   : > { %s239_s19 = sshll.u32 %s1595_s18, 4  ;;  %p1345_p11 = pneg %p1698_p10  ;;  %s240_s19 = int_to_ptr.vmem [resolvable:$true] %s239_s19 }
  0x14   : > { %s258_s22 = sshll.u32 %s1596_s21, 4  ;;  %s1467_s25 = scalar_lea.hbm %s2062_s1, 256  ;;  %s1710_s22 = int_to_ptr.vmem [resolvable:$true] %s258_s22 }
  0x15   : > { %p1706_p12 = pnand %p2070_p9, %p1345_p11  ;;  %p1468_p13 = scmp.ne.s32.totalorder %s2062_s1, %s1467_s25 }
  0x16   : > { %p1474_p3 = scmp.lt.u32.totalorder %s1467_s25, %s2062_s1 }
  0x17   : > { %p1469_p0 = pneg %p1706_p12 }
  0x19   : > { %p1470_p1 = pnand %p1469_p0, %p1468_p13 }
  0x1b   : > { %p1471_p2 = pneg %p1470_p1 }
  0x1d   : > { %p1476_p4 = pnand %p1474_p3, %p1471_p2 }
  0x1f   : > { %1479 = shalt.err (!%p1476_p4)
}
  0x20   : > { %s1480_s18 = scalar_lea.vmem %s240_s19, 256  ;;  %p1488_p9 = scmp.lt.s32.totalorder %s240_s19, %s240_s19 }
  0x21   : > { %p1481_p7 = scmp.ne.s32.totalorder %s240_s19, %s1480_s18  ;;  %p1489_p6 = scmp.lt.s32.totalorder %s1480_s18, %s1480_s18 }
  0x23   : > { %p1483_p8 = pnand %p1481_p7, %p1469_p0  ;;  %p1490_p5 = por %p1489_p6, %p1488_p9 }
  0x25   : > { %p1484_p11 = pneg %p1483_p8 }
  0x27   : > { %p1491_p10 = pnand %p1490_p5, %p1484_p11 }
  0x29   : > { %1494 = shalt.err (!%p1491_p10)
}
  0x2a   : > { %s1597_s21 = smov 128   ;;  %s1598_s23 = smov 8  }
  0x2b   : > { %1348 = dma.hbm_to_vmem [thread:$0]  (!%p1706_p12), %s2062_s1, 256, %s240_s19, [#allocation3], %s1597_s21, %s1597_s21, %s1598_s23  }
  0x2c   : > { %s1495_s12 = scalar_lea.hbm %s2065_s4, 256 }
  0x2d   : > { %p1496_p13 = scmp.ne.s32.totalorder %s2065_s4, %s1495_s12  ;;  %p1502_p9 = scmp.lt.u32.totalorder %s1495_s12, %s2065_s4 }
  0x2f   : > { %p1498_p5 = pnand %p1496_p13, %p1469_p0 }
  0x31   : > { %p1499_p6 = pneg %p1498_p5 }
  0x33   : > { %p1504_p10 = pnand %p1502_p9, %p1499_p6 }
  0x35   : > { %1507 = shalt.err (!%p1504_p10)
}
  0x36   : > { %s1508_s19 = scalar_lea.vmem %s1710_s22, 256  ;;  %p1516_p4 = scmp.lt.s32.totalorder %s1710_s22, %s1710_s22 }
  0x37   : > { %p1509_p1 = scmp.ne.s32.totalorder %s1710_s22, %s1508_s19  ;;  %p1517_p7 = scmp.lt.s32.totalorder %s1508_s19, %s1508_s19 }
  0x39   : > { %p1511_p2 = pnand %p1509_p1, %p1469_p0  ;;  %p1518_p8 = por %p1517_p7, %p1516_p4 }
  0x3b   : > { %p1512_p3 = pneg %p1511_p2 }
  0x3d   : > { %p1519_p11 = pnand %p1518_p8, %p1512_p3 }
  0x3f   : > { %1522 = shalt.err (!%p1519_p11)
}
  0x40   : > { %1351 = dma.hbm_to_vmem [thread:$0]  (!%p1706_p12), %s2065_s4, 256, %s1710_s22, [#allocation6], %s1597_s21, %s1597_s21, %s1598_s23  }
  0x41   : > { %p2080_p13 = scmp.ne.s32.totalorder %s2078_s17, 0 }
  0x42   : > { %p2081_p5 = scmp.eq.s32.totalorder (!%p2080_p13), %s1670_s9, 0 }
  0x43   : > { %291 = sbr.rel (%p2080_p13) target bundleno = 1008 (0x3f0), region = 52 }
  0x4a   : > { %1568 = dma.done.wait (%p2081_p5), [#allocation3], 256   ;;  %p2082_p0 = pmov %p2081_p5 }
  0x4c   : > { %1570 = vsyncadd (%p2082_p0), [#allocation3], 4294967040  ;;  %p2083_p6 = pmov %p2082_p0 }
  0x4d   : > { %p2084_p9 = pmov %p2082_p0 }
  0x4e   : > { %1572 = dma.done.wait (%p2083_p6), [#allocation6], 256  }
  0x4f   : > { %1574 = vsyncadd (%p2084_p9), [#allocation6], 4294967040  ;;  %p329_p10 = scmp.lt.s32.totalorder %s1670_s9, 1  ;;  %v382_v24 = vld [vmem:[#allocation5] sm:$0xff]  ;;  %vm386_vm0 = vcmask 523264   ;;  %v383_v45 = vld [vmem:[#allocation5 + $0x8] sm:$0xff] }
  0x50   : > { %1274 = vmatprep.mubr.msk.f32.mxu0 %vm386_vm0, %v382_v24  ;;  %v470_v46 = vld [vmem:[%s2067_s6] sm:$0xff]  ;;  %vm478_vm1 = vcmask 130048   ;;  %v1599_v47 = vmov 0.0   ;;  %v611_v48 = vld [vmem:[%s2063_s2 + $0x8] sm:$0xff]  ;;  %v1600_v50 = vmov 0   ;;  %v896_v53 = vld [vmem:[%s2068_s7 + $0x10] sm:$0xff] }
  0x51   : > { %s330_s20 = scalar_select %p329_p10, %s1670_s9, 1  ;;  %1281 = vmatprep.mubr.msk.f32.mxu1 %vm478_vm1, %v470_v46  ;;  %v610_v49 = vld [vmem:[%s2063_s2] sm:$0xff]  ;;  %1402 = vset.pattern.permute.xlu1 %v1600_v50  ;;  %v895_v52 = vld [vmem:[%s2068_s7 + $0x8] sm:$0xff]  ;;  %v897_v54 = vld [vmem:[%s2068_s7 + $0x18] sm:$0xff] }
  0x52   : > { %1401 = vset.pattern.permute.xlu0 %v1600_v50  ;;  %v894_v51 = vld [vmem:[%s2068_s7] sm:$0xff]  ;;  %v899_v56 = vld [vmem:[%s2068_s7 + $0x28] sm:$0xff]  ;;  %v473_v24 = vld [vmem:[%s2067_s6 + $0x18] sm:$0xff]  ;;  %p2085_p1 = scmp.ne.s32.totalorder %s2076_s15, 0  ;;  %s1601_s13 = smov [#allocation7]  }
  0x53   : > { %s1236_s22 = sshll.u32 %s330_s20, 7  ;;  %v898_v55 = vld [vmem:[%s2068_s7 + $0x20] sm:$0xff]  ;;  %v385_v57 = vld [vmem:[%s2066_s5 + $0x8] sm:$0xff]  ;;  %s1527_s18 = sshll.u32 %s1601_s13, 4  ;;  %s1528_s18 = int_to_ptr.vmem [resolvable:$false] %s1527_s18 }
  0x54   : > { %s333_s23 = scalar_lea.vmem %s2061_s0, %s1236_s22  ;;  %v384_v58 = vld [vmem:[%s2066_s5] sm:$0xff]  ;;  %s326_s22 = sand.u32 1, %s1585_s28  }
  0x55   : > { %v1774_v0 = vld [vmem:[%s333_s23 + $0x20] sm:$0xff]  ;;  %v1776_v1 = vld [vmem:[%s333_s23 + $0x28] sm:$0xff]  ;;  %v1784_v5 = vld [vmem:[%s333_s23 + $0x30] sm:$0xff]  ;;  %s1192_s21 = sshll.u32 %s326_s22, 7  ;;  %s1529_s19 = scalar_lea.vmem %s1528_s18, 4096 }
  0x56   : > { %v1778_v2 = vld [vmem:[%s333_s23] sm:$0xff]  ;;  %v356_v3 = vadd.f32 %v1776_v1, %v1774_v0  ;;  %v1782_v4 = vld [vmem:[%s333_s23 + $0x8] sm:$0xff]  ;;  %v1786_v6 = vld [vmem:[%s333_s23 + $0x38] sm:$0xff]  ;;  %s1977_s17 = scalar_lea.vmem [#allocation7], %s1192_s21 }
  0x57   : > { %v350_v7 = vadd.f32 %v1782_v4, %v1778_v2  ;;  %v1790_v8 = vld [vmem:[%s333_s23 + $0x10] sm:$0xff]  ;;  %v1792_v9 = vld [vmem:[%s333_s23 + $0x18] sm:$0xff]  ;;  %v359_v10 = vadd.f32 %v1786_v6, %v1784_v5  ;;  %v1802_v14 = vld [vmem:[%s333_s23 + $0x40] sm:$0xff]  ;;  %s1100_s24 = sshll.u32 %s1977_s17, 4  ;;  %s2012_s24 = int_to_ptr.vmem [resolvable:$true] %s1100_s24 }
  0x58   : > { %357 = vadd.xlane.f32.xlu1 %v356_v3  ;;  %v353_v11 = vadd.f32 %v1792_v9, %v1790_v8  ;;  %v1798_v12 = vld [vmem:[%s333_s23 + $0x50] sm:$0xff]  ;;  %v1800_v13 = vld [vmem:[%s333_s23 + $0x58] sm:$0xff]  ;;  %v1804_v15 = vld [vmem:[%s333_s23 + $0x48] sm:$0xff]  ;;  %s1523_s12 = scalar_lea.vmem %s2012_s24, 2048  ;;  %p1530_p4 = scmp.lt.s32.totalorder %s2012_s24, %s1528_s18 }
  0x59   : > { %351 = vadd.xlane.f32.xlu0 %v350_v7  ;;  %v365_v16 = vadd.f32 %v1800_v13, %v1798_v12  ;;  %v362_v17 = vadd.f32 %v1804_v15, %v1802_v14  ;;  %v1810_v18 = vld [vmem:[%s333_s23 + $0x70] sm:$0xff]  ;;  %v1812_v19 = vld [vmem:[%s333_s23 + $0x78] sm:$0xff]  ;;  %v1814_v20 = vld [vmem:[%s333_s23 + $0x60] sm:$0xff]  ;;  %p1524_p12 = scmp.ne.s32.totalorder %s2012_s24, %s1523_s12  ;;  %p1531_p7 = scmp.lt.s32.totalorder %s1529_s19, %s1523_s12 }
  0x5a   : > { %v1816_v21 = vld [vmem:[%s333_s23 + $0x68] sm:$0xff]  ;;  %v371_v22 = vadd.f32 %v1812_v19, %v1810_v18  ;;  %s1237_s23 = sshll.u32 %s1670_s9, 11  ;;  %s2020_s9 = scalar_lea.sflag [#allocation4], %s326_s22 }
  0x5b   : > { %v368_v23 = vadd.f32 %v1816_v21, %v1814_v20  ;;  %s2010_s10 = scalar_lea.hbm %s2069_s8, %s1237_s23  ;;  %p1525_p2 = pnand %p1524_p12, %p2085_p1 }
  0x5c   : > { %360 = vadd.xlane.f32.xlu1 %v359_v10  ;;  %v1313_v10 = vpack.c.bf16 %v1792_v9, %v1782_v4  ;;  %p1532_p8 = por %p1531_p7, %p1530_p4 }
  0x5d   : > { %354 = vadd.xlane.f32.xlu0 %v353_v11  ;;  %v1315_v11 = vpack.c.bf16 %v1790_v8, %v1778_v2  ;;  %p1526_p3 = pneg %p1525_p2 }
  0x5f   : > { %p1533_p11 = pnand %p1532_p8, %p1526_p3 }
  0x60   : > { %366 = vadd.xlane.f32.xlu1 %v365_v16  ;;  %v471_v16 = vld [vmem:[%s2067_s6 + $0x8] sm:$0xff] }
  0x61   : > { %363 = vadd.xlane.f32.xlu0 %v362_v17  ;;  %v472_v17 = vld [vmem:[%s2067_s6 + $0x10] sm:$0xff] }
  0x64   : > { %372 = vadd.xlane.f32.xlu1 %v371_v22  ;;  %v1317_v22 = vpack.c.bf16 %v1786_v6, %v1776_v1 }
  0x65   : > { %369 = vadd.xlane.f32.xlu0 %v368_v23  ;;  %v1319_v23 = vpack.c.bf16 %v1784_v5, %v1774_v0 }
  0x75   : > { %619 = vperm.xlu1 %1402, %v611_v48  }
  0x79   : > { %904 = vperm.xlu1 %1402, %v894_v51  }
  0x7b   : > { %614 = vperm.xlu0 %1401, %v610_v49  }
  0x7d   : > { %914 = vperm.xlu1 %1402, %v896_v53  }
  0x7f   : > { %909 = vperm.xlu0 %1401, %v895_v52  }
  0x81   : > { %924 = vperm.xlu1 %1402, %v898_v55  }
  0x83   : > { %919 = vperm.xlu0 %1401, %v897_v54  }
  0x87   : > { %929 = vperm.xlu0 %1401, %v899_v56  }
  0xe5   : > { %v358_v25 = vpop.xlane.xlu1 %357 }
  0xe6   : > { %v352_v26 = vpop.xlane.xlu0 %351  ;;  %v376_v29 = vmul.f32 0.00390625, %v358_v25  ;;  %v474_v25 = vld [vmem:[%s2067_s6 + $0x20] sm:$0xff] }
  0xe7   : > { %v374_v30 = vmul.f32 0.00390625, %v352_v26  ;;  %v1321_v26 = vpack.c.bf16 %v1800_v13, %v1804_v15 }
  0xe9   : > { %v361_v27 = vpop.xlane.xlu1 %360 }
  0xea   : > { %v355_v28 = vpop.xlane.xlu0 %354  ;;  %v377_v31 = vmul.f32 0.00390625, %v361_v27  ;;  %v1323_v27 = vpack.c.bf16 %v1798_v12, %v1802_v14 }
  0xeb   : > { %v375_v32 = vmul.f32 0.00390625, %v355_v28  ;;  %v475_v28 = vld [vmem:[%s2067_s6 + $0x28] sm:$0xff] }
  0xec   : > { %v1297_v37 = vpack.c.bf16 %v377_v31, %v376_v29  ;;  %v476_v29 = vld [vmem:[%s2067_s6 + $0x30] sm:$0xff]  ;;  %v1327_v31 = vpack.c.bf16 %v1810_v18, %v1814_v20 }
  0xed   : > { %v1293_v33 = vpack.c.bf16 %v375_v32, %v374_v30  ;;  %v367_v34 = vpop.xlane.xlu1 %366  ;;  %v1325_v30 = vpack.c.bf16 %v1812_v19, %v1816_v21  ;;  %v477_v32 = vld [vmem:[%s2067_s6 + $0x38] sm:$0xff] }
  0xee   : > { %v379_v35 = vmul.f32 0.00390625, %v367_v34  ;;  %v364_v36 = vpop.xlane.xlu0 %363  ;;  %v609_v34 = vld [vmem:[#allocation2 + $0x8] sm:$0xff] }
  0xef   : > { %1294 = vmatprep.subr.bf16.mxu0 %v1293_v33  ;;  %v378_v38 = vmul.f32 0.00390625, %v364_v36 }
  0xf0   : > { %1296 = vmatpush3.bf16.msra.mxu0 %v1293_v33  ;;  %v608_v33 = vld [vmem:[#allocation2] sm:$0xff] }
  0xf1   : > { %1298 = vmatprep.subr.bf16.mxu0 %v1297_v37  ;;  %v1301_v39 = vpack.c.bf16 %v379_v35, %v378_v38  ;;  %v373_v40 = vpop.xlane.xlu1 %372 }
  0xf2   : > { %v381_v41 = vmul.f32 0.00390625, %v373_v40  ;;  %v370_v42 = vpop.xlane.xlu0 %369 }
  0xf3   : > { %v380_v43 = vmul.f32 0.00390625, %v370_v42 }
  0xf4   : > { %1300 = vmatpush3.bf16.msra.mxu0 %v1297_v37 }
  0xf5   : > { %v1305_v44 = vpack.c.bf16 %v381_v41, %v380_v43  ;;  %1302 = vmatprep.subr.bf16.mxu0 %v1301_v39  ;;  %v901_v43 = vld [vmem:[%s2068_s7 + $0x38] sm:$0xff]  ;;  %v620_v49 = vpop.permute.xlu1 %619 }
  0xf8   : > { %1304 = vmatpush3.bf16.msra.mxu0 %v1301_v39 }
  0xf9   : > { %1306 = vmatprep.subr.bf16.mxu0 %v1305_v44 }
  0xfa   : > { %v615_v46 = vpop.permute.xlu0 %614 }
  0xfc   : > { %1308 = vmatpush3.bf16.msra.mxu0 %v1305_v44 }
  0xff   : > { %1275 = vmatmul.mubr.msk.f32.vlgmr.msra.gmra.mrb[0].mxu0 %vm386_vm0, %v383_v45 }
 0x100   : > { %845 = vmatprep.mubr.f32.mxu0 %v1599_v47 }
 0x1d2   : > { %v1276_v59 = vpop.f32.mrb[0].mxu0 }
 0x1d3   : > { %v465_v60 = vadd.f32 %v1276_v59, %v385_v57  ;;  %v459_v61 = vpop.f32.mrb[1].mxu0 }
 0x1d4   : > { %v460_v62 = vadd.f32 %v459_v61, %v384_v58  ;;  %v900_v61 = vld [vmem:[%s2068_s7 + $0x30] sm:$0xff] }
 0x1d5   : > { %v469_v63 = vmax.f32 %v465_v60, 0.0 }
 0x1d6   : > { %v468_v3 = vmax.f32 %v460_v62, 0.0  ;;  %v709_v62 = vld [vmem:[%s2064_s3] sm:$0xff] }
 0x1d8   : > { %v1309_v7 = vpack.c.bf16 %v469_v63, %v468_v3  ;;  %v714_v63 = vld [vmem:[%s2064_s3 + $0x28] sm:$0xff] }
 0x1d9   : > { %v710_v3 = vld [vmem:[%s2064_s3 + $0x8] sm:$0xff] }
 0x1da   : > { %1310 = vmatprep.subr.bf16.mxu1 %v1309_v7 }
 0x1db   : > { %1312 = vmatpush3.bf16.msra.mxu1 %v1309_v7  ;;  %v715_v7 = vld [vmem:[%s2064_s3 + $0x30] sm:$0xff] }
 0x1dc   : > { %1314 = vmatprep.subr.bf16.mxu1 %v1313_v10  ;;  %v711_v10 = vld [vmem:[%s2064_s3 + $0x10] sm:$0xff] }
 0x1de   : > { %1282 = vmatmul.mubr.msk.f32.vlgmr.msra.gmra.mrb[0].mxu1 %vm478_vm1, %v471_v16  ;;  %v712_v16 = vld [vmem:[%s2064_s3 + $0x18] sm:$0xff] }
 0x1df   : > { %1316 = vmatpush1.bf16.msra.mxu1 %v1315_v11  ;;  %1284 = vmatprep.mubr.msk.f32.mxu1 %vm478_vm1, %v472_v17  ;;  %v716_v11 = vld [vmem:[%s2064_s3 + $0x38] sm:$0xff]  ;;  %v713_v17 = vld [vmem:[%s2064_s3 + $0x20] sm:$0xff] }
 0x1e0   : > { %1318 = vmatprep.subr.bf16.mxu1 %v1317_v22  ;;  %v905_v22 = vpop.permute.xlu1 %904 }
 0x1e2   : > { %1285 = vmatmul.mubr.msk.f32.gmra.mrb[2].mxu1 %vm478_vm1, %v473_v24 }
 0x1e3   : > { %1320 = vmatpush1.bf16.msra.mxu1 %v1319_v23  ;;  %1287 = vmatprep.mubr.msk.f32.mxu1 %vm478_vm1, %v474_v25 }
 0x1e4   : > { %1322 = vmatprep.subr.bf16.mxu1 %v1321_v26  ;;  %v1952_v23 = vpop.permute.xlu1 %914 }
 0x1e6   : > { %1288 = vmatmul.mubr.msk.f32.gmra.mrb[4].mxu1 %vm478_vm1, %v475_v28 }
 0x1e7   : > { %1324 = vmatpush1.bf16.msra.mxu1 %v1323_v27  ;;  %1290 = vmatprep.mubr.msk.f32.mxu1 %vm478_vm1, %v476_v29  ;;  %v910_v29 = vpop.permute.xlu0 %909 }
 0x1e8   : > { %1326 = vmatprep.subr.bf16.mxu1 %v1325_v30  ;;  %v1954_v24 = vpop.permute.xlu1 %924 }
 0x1ea   : > { %1291 = vmatmul.mubr.msk.f32.gmra.mrb[6].mxu1 %vm478_vm1, %v477_v32 }
 0x1eb   : > { %1328 = vmatpush1.bf16.msra.mxu1 %v1327_v31  ;;  %692 = vmatprep.mubr.f32.mxu1 %v1599_v47  ;;  %v1958_v31 = vpop.permute.xlu0 %919 }
 0x1ee   : > { %1205 = vmatmul.mubr.msk.f32.vlgmr.msra.gmra.mrb[8].mxu1 %vm386_vm0, %v608_v33 }
 0x1ef   : > { %698 = vmatprep.mubr.f32.mxu1 %v1599_v47  ;;  %v930_v32 = vpop.permute.xlu0 %929 }
 0x1f2   : > { %1206 = vmatmul.mubr.msk.f32.gmra.mrb[10].mxu1 %vm386_vm0, %v609_v34 }
 0x1f3   : > { %875 = vmatprep.mubr.f32.mxu1 %v1599_v47 }
 0x2b1   : > { %v1283_v35 = vpop.f32.mrb[0].mxu1 }
 0x2b2   : > { %724 = vperm.xlu1 %1402, %v1283_v35   ;;  %v569_v36 = vpop.f32.mrb[1].mxu1 }
 0x2b5   : > { %v1286_v37 = vpop.f32.mrb[2].mxu1 }
 0x2b6   : > { %719 = vperm.xlu1 %1402, %v569_v36   ;;  %v579_v38 = vpop.f32.mrb[3].mxu1 }
 0x2b9   : > { %v1289_v39 = vpop.f32.mrb[4].mxu1 }
 0x2ba   : > { %734 = vperm.xlu1 %1402, %v1286_v37   ;;  %v589_v40 = vpop.f32.mrb[5].mxu1 }
 0x2bd   : > { %v1292_v41 = vpop.f32.mrb[6].mxu1 }
 0x2be   : > { %729 = vperm.xlu1 %1402, %v579_v38   ;;  %754 = vperm.xlu0 %1401, %v1292_v41   ;;  %v599_v42 = vpop.f32.mrb[7].mxu1 }
 0x2c1   : > { %v694_v44 = vpop.f32.mrb[8].mxu1 }
 0x2c2   : > { %744 = vperm.xlu1 %1402, %v1289_v39   ;;  %939 = vperm.xlu0 %1401, %v901_v43   ;;  %v696_v45 = vpop.f32.mrb[9].mxu1  ;;  %v695_v48 = vadd.f32 %v694_v44, %v615_v46 }
 0x2c3   : > { %v697_v50 = vadd.f32 %v696_v45, %v615_v46 }
 0x2c4   : > { %v705_v55 = vmax.f32 %v695_v48, 0.0 }
 0x2c5   : > { %v700_v51 = vpop.f32.mrb[10].mxu1  ;;  %v706_v57 = vmax.f32 %v697_v50, 0.0 }
 0x2c6   : > { %v701_v52 = vadd.f32 %v700_v51, %v620_v49  ;;  %739 = vperm.xlu1 %1402, %v589_v40   ;;  %v702_v53 = vpop.f32.mrb[11].mxu1 }
 0x2c7   : > { %v703_v54 = vadd.f32 %v702_v53, %v620_v49 }
 0x2c8   : > { %v707_v56 = vmax.f32 %v701_v52, 0.0 }
 0x2c9   : > { %v708_v58 = vmax.f32 %v703_v54, 0.0 }
 0x2ca   : > { %v1331_v59 = vpack.c.bf16 %v707_v56, %v705_v55  ;;  %749 = vperm.xlu1 %1402, %v599_v42  }
 0x2cb   : > { %v1329_v60 = vpack.c.bf16 %v708_v58, %v706_v57 }
 0x2cd   : > { %1330 = vmatprep.subr.bf16.mxu0 %v1329_v60  ;;  %1333 = vmatprep.subr.bf16.mxu1 %v1329_v60 }
 0x2ce   : > { %934 = vperm.xlu1 %1402, %v900_v61   ;;  %1332 = vmatpush1.bf16.msra.mxu0 %v1331_v59 }
 0x2cf   : > { %1334 = vmatpush1.bf16.msra.mxu1 %v1331_v59 }
 0x2d1   : > { %1207 = vmatmul.mubr.msk.f32.vlgmr.msra.gmra.mrb[2].mxu0 %vm478_vm1, %v709_v62 }
 0x2d2   : > { %1212 = vmatmul.mubr.msk.f32.vlgmr.msra.gmra.mrb[12].mxu1 %vm478_vm1, %v714_v63  ;;  %851 = vmatprep.mubr.f32.mxu0 %v1599_v47 }
 0x2d3   : > { %881 = vmatprep.mubr.f32.mxu1 %v1599_v47 }
 0x2d5   : > { %1208 = vmatmul.mubr.msk.f32.gmra.mrb[4].mxu0 %vm478_vm1, %v710_v3 }
 0x2d6   : > { %1213 = vmatmul.mubr.msk.f32.gmra.mrb[14].mxu1 %vm478_vm1, %v715_v7  ;;  %857 = vmatprep.mubr.f32.mxu0 %v1599_v47 }
 0x2d7   : > { %887 = vmatprep.mubr.f32.mxu1 %v1599_v47 }
 0x2d9   : > { %1209 = vmatmul.mubr.msk.f32.gmra.mrb[6].mxu0 %vm478_vm1, %v711_v10 }
 0x2da   : > { %1214 = vmatmul.mubr.msk.f32.gmra.mrb[16].mxu1 %vm478_vm1, %v716_v11  ;;  %863 = vmatprep.mubr.f32.mxu0 %v1599_v47 }
 0x2dd   : > { %1210 = vmatmul.mubr.msk.f32.gmra.mrb[8].mxu0 %vm478_vm1, %v712_v16 }
 0x2de   : > { %869 = vmatprep.mubr.f32.mxu0 %v1599_v47 }
 0x2e1   : > { %1211 = vmatmul.mubr.msk.f32.gmra.mrb[10].mxu0 %vm478_vm1, %v713_v17 }
 0x331   : > { %v725_v25 = vpop.permute.xlu1 %724 }
 0x335   : > { %v720_v26 = vpop.permute.xlu1 %719 }
 0x339   : > { %v1956_v27 = vpop.permute.xlu1 %734 }
 0x33d   : > { %v730_v28 = vpop.permute.xlu1 %729  ;;  %v755_v43 = vpop.permute.xlu0 %754 }
 0x341   : > { %v745_v30 = vpop.permute.xlu1 %744 }
 0x345   : > { %v1960_v47 = vpop.permute.xlu1 %739 }
 0x349   : > { %v750_v33 = vpop.permute.xlu1 %749 }
 0x34d   : > { %v935_v58 = vpop.permute.xlu1 %934 }
 0x3a4   : > { %v847_v34 = vpop.f32.mrb[2].mxu0 }
 0x3a5   : > { %v848_v35 = vadd.f32 %v847_v34, %v720_v26  ;;  %v877_v36 = vpop.f32.mrb[12].mxu1  ;;  %v849_v37 = vpop.f32.mrb[3].mxu0 }
 0x3a6   : > { %v878_v38 = vadd.f32 %v877_v36, %v745_v30  ;;  %v850_v39 = vadd.f32 %v849_v37, %v720_v26  ;;  %v879_v40 = vpop.f32.mrb[13].mxu1 }
 0x3a7   : > { %v942_v41 = vadd.f32 %v905_v22, %v848_v35  ;;  %v880_v42 = vadd.f32 %v879_v40, %v745_v30 }
 0x3a8   : > { %v952_v44 = vadd.f32 %v930_v32, %v878_v38  ;;  %v943_v45 = vadd.f32 %v905_v22, %v850_v39  ;;  %v853_v46 = vpop.f32.mrb[4].mxu0 }
 0x3a9   : > { %v1215_v48 = vmul.f32 -1.442695, %v942_v41  ;;  %v953_v49 = vadd.f32 %v930_v32, %v880_v42  ;;  %v854_v50 = vadd.f32 %v853_v46, %v725_v25  ;;  %v883_v51 = vpop.f32.mrb[14].mxu1  ;;  %v855_v52 = vpop.f32.mrb[5].mxu0 }
 0x3aa   : > { %v1225_v53 = vmul.f32 -1.442695, %v952_v44  ;;  %v1216_v54 = vmul.f32 -1.442695, %v943_v45  ;;  %v884_v55 = vadd.f32 %v883_v51, %v750_v33  ;;  %v856_v56 = vadd.f32 %v855_v52, %v725_v25  ;;  %v885_v57 = vpop.f32.mrb[15].mxu1  ;;  %v940_v32 = vpop.permute.xlu0 %939 }
 0x3ab   : > { %1403 = vpow2.f32 %v1215_v48  ;;  %v1226_v59 = vmul.f32 -1.442695, %v953_v49  ;;  %v944_v60 = vadd.f32 %v910_v29, %v854_v50  ;;  %v886_v61 = vadd.f32 %v885_v57, %v750_v33 }
 0x3ac   : > { %1405 = vpow2.f32 %v1225_v53  ;;  %v954_v62 = vadd.f32 %v935_v58, %v884_v55  ;;  %v945_v63 = vadd.f32 %v910_v29, %v856_v56  ;;  %v859_v3 = vpop.f32.mrb[6].mxu0 }
 0x3ad   : > { %1407 = vpow2.f32 %v1216_v54  ;;  %v1217_v7 = vmul.f32 -1.442695, %v944_v60  ;;  %v955_v10 = vadd.f32 %v935_v58, %v886_v61  ;;  %v860_v11 = vadd.f32 %v859_v3, %v730_v28  ;;  %v889_v16 = vpop.f32.mrb[16].mxu1  ;;  %v861_v17 = vpop.f32.mrb[7].mxu0 }
 0x3ae   : > { %1409 = vpow2.f32 %v1226_v59  ;;  %v1227_v22 = vmul.f32 -1.442695, %v954_v62  ;;  %v1218_v26 = vmul.f32 -1.442695, %v945_v63  ;;  %v890_v25 = vadd.f32 %v889_v16, %v755_v43  ;;  %v891_v30 = vpop.f32.mrb[17].mxu1 }
 0x3af   : > { %1411 = vpow2.f32 %v1217_v7  ;;  %v1228_v34 = vmul.f32 -1.442695, %v955_v10  ;;  %v946_v33 = vadd.f32 %v1952_v23, %v860_v11  ;;  %v862_v35 = vadd.f32 %v861_v17, %v730_v28 }
 0x3b0   : > { %1413 = vpow2.f32 %v1227_v22  ;;  %v956_v29 = vadd.f32 %v940_v32, %v890_v25  ;;  %v892_v36 = vadd.f32 %v891_v30, %v755_v43  ;;  %v865_v37 = vpop.f32.mrb[8].mxu0 }
 0x3b1   : > { %1415 = vpow2.f32 %v1218_v26  ;;  %v1219_v38 = vmul.f32 -1.442695, %v946_v33  ;;  %v947_v39 = vadd.f32 %v1952_v23, %v862_v35  ;;  %v866_v40 = vadd.f32 %v865_v37, %v1956_v27  ;;  %v867_v41 = vpop.f32.mrb[9].mxu0 }
 0x3b2   : > { %1417 = vpow2.f32 %v1228_v34  ;;  %v1229_v42 = vmul.f32 -1.442695, %v956_v29  ;;  %v957_v44 = vadd.f32 %v940_v32, %v892_v36  ;;  %v868_v58 = vadd.f32 %v867_v41, %v1956_v27 }
 0x3b3   : > { %1419 = vpow2.f32 %v1219_v38  ;;  %v1220_v45 = vmul.f32 -1.442695, %v947_v39  ;;  %v948_v46 = vadd.f32 %v1958_v31, %v866_v40 }
 0x3b4   : > { %1421 = vpow2.f32 %v1229_v42  ;;  %v1230_v28 = vmul.f32 -1.442695, %v957_v44  ;;  %v871_v48 = vpop.f32.mrb[10].mxu0  ;;  %v949_v27 = vadd.f32 %v1958_v31, %v868_v58 }
 0x3b5   : > { %v1404_v49 = vpop.eup %1403  ;;  %1423 = vpow2.f32 %v1220_v45  ;;  %v1221_v43 = vmul.f32 -1.442695, %v948_v46  ;;  %v873_v50 = vpop.f32.mrb[11].mxu0  ;;  %v872_v61 = vadd.f32 %v871_v48, %v1960_v47 }
 0x3b6   : > { %v1406_v51 = vpop.eup %1405  ;;  %v1006_v52 = vadd.f32 1.0, %v1404_v49  ;;  %1425 = vpow2.f32 %v1230_v28  ;;  %v874_v3 = vadd.f32 %v873_v50, %v1960_v47  ;;  %v1222_v29 = vmul.f32 -1.442695, %v949_v27 }
 0x3b7   : > { %v1408_v23 = vpop.eup %1407  ;;  %v1016_v53 = vadd.f32 1.0, %v1406_v51  ;;  %1427 = vpow2.f32 %v1221_v43  ;;  %v950_v26 = vadd.f32 %v1954_v24, %v872_v61 }
 0x3b8   : > { %v1410_v54 = vpop.eup %1409  ;;  %1429 = vrcp.f32 %v1006_v52  ;;  %v1007_v55 = vadd.f32 1.0, %v1408_v23  ;;  %v951_v47 = vadd.f32 %v1954_v24, %v874_v3 }
 0x3b9   : > { %v1412_v56 = vpop.eup %1411  ;;  %1431 = vrcp.f32 %v1016_v53  ;;  %v1017_v57 = vadd.f32 1.0, %v1410_v54  ;;  %v1223_v37 = vmul.f32 -1.442695, %v950_v26 }
 0x3ba   : > { %v1414_v59 = vpop.eup %1413  ;;  %1433 = vrcp.f32 %v1007_v55  ;;  %v1008_v60 = vadd.f32 1.0, %v1412_v56  ;;  %v1224_v40 = vmul.f32 -1.442695, %v951_v47 }
 0x3bb   : > { %v1416_v62 = vpop.eup %1415  ;;  %1435 = vrcp.f32 %v1017_v57  ;;  %v1018_v63 = vadd.f32 1.0, %v1414_v59 }
 0x3bc   : > { %v1418_v7 = vpop.eup %1417  ;;  %1437 = vrcp.f32 %v1008_v60  ;;  %v1009_v10 = vadd.f32 1.0, %v1416_v62 }
 0x3bd   : > { %v1420_v11 = vpop.eup %1419  ;;  %1439 = vrcp.f32 %v1018_v63  ;;  %v1019_v16 = vadd.f32 1.0, %v1418_v7 }
 0x3be   : > { %v1422_v17 = vpop.eup %1421  ;;  %1441 = vrcp.f32 %v1009_v10  ;;  %v1010_v22 = vadd.f32 1.0, %v1420_v11 }
 0x3bf   : > { %v1424_v25 = vpop.eup %1423  ;;  %1443 = vrcp.f32 %v1019_v16  ;;  %v1020_v30 = vadd.f32 1.0, %v1422_v17 }
 0x3c0   : > { %v1426_v32 = vpop.eup %1425  ;;  %1445 = vrcp.f32 %v1010_v22  ;;  %v1011_v34 = vadd.f32 1.0, %v1424_v25 }
 0x3c1   : > { %v1428_v33 = vpop.eup %1427  ;;  %1447 = vrcp.f32 %v1020_v30  ;;  %v1021_v35 = vadd.f32 1.0, %v1426_v32 }
 0x3c2   : > { %v1430_v31 = vpop.eup %1429  ;;  %1449 = vrcp.f32 %v1011_v34  ;;  %v1012_v36 = vadd.f32 1.0, %v1428_v33 }
 0x3c3   : > { %v1432_v38 = vpop.eup %1431  ;;  %v1054_v39 = vmul.f32 %v1430_v31, %v1778_v2  ;;  %1451 = vrcp.f32 %v1021_v35 }
 0x3c4   : > { %v1434_v41 = vpop.eup %1433  ;;  %v1064_v42 = vmul.f32 %v1432_v38, %v1798_v12  ;;  %1453 = vrcp.f32 %v1012_v36 }
 0x3c5   : > { %v1436_v24 = vpop.eup %1435  ;;  %1070 = vst [vmem:[%s1977_s17] sm:$0xff] %v1054_v39  ;;  %v1055_v44 = vmul.f32 %v1434_v41, %v1782_v4  ;;  %1455 = vpow2.f32 %v1222_v29 }
 0x3c6   : > { %v1438_v2 = vpop.eup %1437  ;;  %1080 = vst [vmem:[%s1977_s17 + $0x50] sm:$0xff] %v1064_v42  ;;  %v1065_v45 = vmul.f32 %v1436_v24, %v1800_v13  ;;  %1457 = vpow2.f32 %v1223_v37 }
 0x3c7   : > { %v1440_v12 = vpop.eup %1439  ;;  %1071 = vst [vmem:[%s1977_s17 + $0x8] sm:$0xff] %v1055_v44  ;;  %v1056_v46 = vmul.f32 %v1438_v2, %v1790_v8  ;;  %1459 = vpow2.f32 %v1224_v40 }
 0x3c8   : > { %v1442_v28 = vpop.eup %1441  ;;  %1081 = vst [vmem:[%s1977_s17 + $0x58] sm:$0xff] %v1065_v45  ;;  %v1066_v48 = vmul.f32 %v1440_v12, %v1814_v20 }
 0x3c9   : > { %v1444_v4 = vpop.eup %1443  ;;  %1072 = vst [vmem:[%s1977_s17 + $0x10] sm:$0xff] %v1056_v46  ;;  %v1057_v49 = vmul.f32 %v1442_v28, %v1792_v9 }
 0x3ca   : > { %v1446_v43 = vpop.eup %1445  ;;  %1082 = vst [vmem:[%s1977_s17 + $0x60] sm:$0xff] %v1066_v48  ;;  %v1067_v13 = vmul.f32 %v1444_v4, %v1816_v21 }
 0x3cb   : > { %v1448_v50 = vpop.eup %1447  ;;  %1073 = vst [vmem:[%s1977_s17 + $0x18] sm:$0xff] %v1057_v49  ;;  %v1058_v8 = vmul.f32 %v1446_v43, %v1774_v0 }
 0x3cc   : > { %v1450_v51 = vpop.eup %1449  ;;  %1083 = vst [vmem:[%s1977_s17 + $0x68] sm:$0xff] %v1067_v13  ;;  %v1068_v20 = vmul.f32 %v1448_v50, %v1810_v18 }
 0x3cd   : > { %v1452_v52 = vpop.eup %1451  ;;  %1074 = vst [vmem:[%s1977_s17 + $0x20] sm:$0xff] %v1058_v8  ;;  %v1059_v23 = vmul.f32 %v1450_v51, %v1776_v1 }
 0x3ce   : > { %v1454_v9 = vpop.eup %1453  ;;  %1084 = vst [vmem:[%s1977_s17 + $0x70] sm:$0xff] %v1068_v20  ;;  %v1069_v21 = vmul.f32 %v1452_v52, %v1812_v19 }
 0x3cf   : > { %v1456_v53 = vpop.eup %1455  ;;  %1075 = vst [vmem:[%s1977_s17 + $0x28] sm:$0xff] %v1059_v23  ;;  %v1060_v54 = vmul.f32 %v1454_v9, %v1784_v5 }
 0x3d0   : > { %v1458_v0 = vpop.eup %1457  ;;  %1085 = vst [vmem:[%s1977_s17 + $0x78] sm:$0xff] %v1069_v21  ;;  %v1013_v55 = vadd.f32 1.0, %v1456_v53 }
 0x3d1   : > { %v1460_v56 = vpop.eup %1459  ;;  %1076 = vst [vmem:[%s1977_s17 + $0x30] sm:$0xff] %v1060_v54  ;;  %v1014_v18 = vadd.f32 1.0, %v1458_v0 }
 0x3d2   : > { %1461 = vrcp.f32 %v1013_v55  ;;  %v1015_v1 = vadd.f32 1.0, %v1460_v56 }
 0x3d3   : > { %1463 = vrcp.f32 %v1014_v18 }
 0x3d4   : > { %1465 = vrcp.f32 %v1015_v1 }
 0x3dc   : > { %v1462_v19 = vpop.eup %1461 }
 0x3dd   : > { %v1464_v57 = vpop.eup %1463  ;;  %v1061_v5 = vmul.f32 %v1462_v19, %v1786_v6 }
 0x3de   : > { %v1466_v58 = vpop.eup %1465  ;;  %v1062_v59 = vmul.f32 %v1464_v57, %v1802_v14 }
 0x3df   : > { %1077 = vst [vmem:[%s1977_s17 + $0x38] sm:$0xff] %v1061_v5  ;;  %v1063_v60 = vmul.f32 %v1466_v58, %v1804_v15 }
 0x3e0   : > { %1078 = vst [vmem:[%s1977_s17 + $0x40] sm:$0xff] %v1062_v59 }
 0x3e1   : > { %1079 = vst [vmem:[%s1977_s17 + $0x48] sm:$0xff] %v1063_v60 }
 0x3e2   : > { %1536 = shalt.err (!%p1533_p11)
}
 0x3e3   : > { %s1537_s29 = scalar_lea.hbm %s2010_s10, 2048  ;;  %s1541_s22 = scalar_lea.hbm %s2069_s8, 4096 }
 0x3e4   : > { %p1538_p13 = scmp.ne.s32.totalorder %s2010_s10, %s1537_s29  ;;  %p1542_p6 = scmp.lt.u32.totalorder %s2010_s10, %s2069_s8 }
 0x3e5   : > { %p1543_p9 = scmp.lt.u32.totalorder %s1541_s22, %s1537_s29  ;;  %p1545_p12 = scmp.lt.u32.totalorder %s1537_s29, %s2010_s10 }
 0x3e6   : > { %p1539_p5 = pnand %p1538_p13, %p2085_p1 }
 0x3e7   : > { %p1544_p10 = por %p1543_p9, %p1542_p6 }
 0x3e8   : > { %p1540_p0 = pneg %p1539_p5 }
 0x3e9   : > { %p1546_p2 = por %p1545_p12, %p1544_p10 }
 0x3eb   : > { %p1547_p3 = pnand %p1546_p2, %p1540_p0 }
 0x3ed   : > { %1550 = shalt.err (!%p1547_p3)
}
 0x3ee   : > { %s1602_s23 = smov 256   ;;  %s1603_s25 = smov 16  }
 0x3ef   : > { %1343 = dma.vmem_to_hbm [thread:$0]  (%p2085_p1), %s2012_s24, 2048, %s2010_s10, %s2020_s9, %s1602_s23, %s1602_s23, %s1603_s25  }
 0x3f0 PF: > { %p1360_p4 = scmp.ge.s32.totalorder %s1593_s30, 2  ;;  %s1115_s26 = sand.u32 1, %s1581_s27  }
 0x3f1   : > { %p2086_p7 = scmp.ne.s32.totalorder %s2077_s16, 0  ;;  %s1116_s12 = scalar_lea.sflag [#allocation4], %s1115_s26 }
 0x3f3   : > { %p1353_p8 = pnand %p1360_p4, %p2086_p7 }
 0x3f5   : > { %1576 = dma.done.wait (!%p1353_p8), %s1116_s12, 2048  }
 0x3f6   : > { %1578 = vsyncadd (!%p1353_p8), %s1116_s12, 4294965248  ;;  %s2087_s13 = sld [smem:[#allocation11_spill]]  ;;  %s2088_s29 = sld [smem:[#allocation12_spill]] }
 0x3f7   : > { %p20_p11 = scmp.ge.s32.totalorder %s1674_s11, 4   ;;  %s2089_s27 = smov %s1585_s28 }
 0x3f8   : > { %s2091_s30 = smov %s1674_s11 }
 0x3f9   :  { %22 = sbr.rel (!%p20_p11) target bundleno = 5 (0x5), region = 96 }
 0x3fc   : > { %s2090_s28 = smov %s2087_s13 }
 0x400   :  { %1121 = vsyncpa [#allocation3], 1 }
 0x401   :  { %1123 = vsyncpa [#allocation3 + $0x1], 1 }
 0x402   :  { %1124 = vsyncpa [#allocation6], 1 }
 0x403   :  { %1125 = vsyncpa [#allocation4], 1 }
 0x404   :  { %1127 = vsyncpa [#allocation4 + $0x1], 1 }

</bundles_post_ra>
